<compile_context>
chip_gen: v5e
topology: v5e:2x2
jax: 0.10.0
libtpu: 0.0.40
codegen_flags: <defaults>
</compile_context>

<pallas_src>
import numpy as np
import jax
import jax.numpy as jnp
from jax.experimental import pallas as pl
from jax.experimental.pallas import tpu as pltpu

LN_EPS = 1e-5


def _round_up(x, m):
    return ((x + m - 1) // m) * m


def _row_tile(n, tmax):
    """Pick a sublane-aligned row tile <= n (pad n up to 8 only when n < 8)."""
    if n < 8:
        return 8, 8
    return min(tmax, (n // 8) * 8), n


def _layernorm_jax(x, g, b, eps=LN_EPS):
    mu = jnp.mean(x, axis=-1, keepdims=True)
    xc = x - mu
    var = jnp.mean(xc * xc, axis=-1, keepdims=True)
    return xc * jax.lax.rsqrt(var + eps) * g + b


# ----------------------------------------------------------------------------
# Pallas kernel 1: fused LayerNorm + Linear + bias + residual
# ----------------------------------------------------------------------------
def _ln_linear_res_kernel(x_ref, g_ref, b_ref, w_ref, bias_ref, res_ref, o_ref):
    x = x_ref[...].astype(jnp.float32)
    mu = jnp.mean(x, axis=-1, keepdims=True)
    xc = x - mu
    var = jnp.mean(xc * xc, axis=-1, keepdims=True)
    xhat = xc * jax.lax.rsqrt(var + LN_EPS)
    y = xhat * g_ref[...] + b_ref[...]
    o_ref[...] = (jnp.dot(y, w_ref[...], preferred_element_type=jnp.float32)
                  + bias_ref[...] + res_ref[...])


def ln_linear_residual(x, gamma, beta, w, bias, res, *, tm=256):
    """y = LayerNorm(x) @ w + bias + res.  x: [N, K], w: [K, M], res: [N, M] -> [N, M] f32."""
    n, k = x.shape
    m = w.shape[1]
    tile, n_run = _row_tile(n, tm)
    x = x.astype(jnp.float32)
    res = res.astype(jnp.float32)
    if n_run != n:                                    # only when n < 8 (tiny copy)
        x = jnp.pad(x, ((0, n_run - n), (0, 0)))
        res = jnp.pad(res, ((0, n_run - n), (0, 0)))
    out = pl.pallas_call(
        _ln_linear_res_kernel,
        out_shape=jax.ShapeDtypeStruct((n_run, m), jnp.float32),
        grid_spec=pltpu.PrefetchScalarGridSpec(
            num_scalar_prefetch=0,
            grid=(pl.cdiv(n_run, tile),),
            in_specs=[
                pl.BlockSpec((tile, k), lambda i: (i, 0)),
                pl.BlockSpec((1, k), lambda i: (0, 0)),     # gamma (VMEM resident)
                pl.BlockSpec((1, k), lambda i: (0, 0)),     # beta
                pl.BlockSpec((k, m), lambda i: (0, 0)),     # weight (VMEM resident)
                pl.BlockSpec((1, m), lambda i: (0, 0)),     # bias
                pl.BlockSpec((tile, m), lambda i: (i, 0)),  # residual (noise_emb[batch])
            ],
            out_specs=pl.BlockSpec((tile, m), lambda i: (i, 0)),
        ),
        compiler_params=pltpu.CompilerParams(dimension_semantics=("parallel",)),
    )(x,
      gamma.reshape(1, k).astype(jnp.float32),
      beta.reshape(1, k).astype(jnp.float32),
      w.astype(jnp.float32),
      bias.reshape(1, m).astype(jnp.float32),
      res)
    return out[:n]


# ----------------------------------------------------------------------------
# Pallas kernel 2: per-edge distance -> GaussianSmearing -> stacked edge_emb Linear
# ----------------------------------------------------------------------------
def _make_edge_kernel(coeff):
    coeff = float(coeff)

    def _edge_kernel(dpos_ref, off_ref, w_ref, b_ref, o_ref):
        d = dpos_ref[...].astype(jnp.float32)                        # [TE, 3]
        dist = jnp.sqrt(jnp.sum(d * d, axis=-1, keepdims=True))      # [TE, 1]
        diff = dist - off_ref[...]                                   # [TE, NG]
        g = jnp.exp(coeff * diff * diff)                             # [TE, NG]
        o_ref[...] = (jnp.dot(g, w_ref[...], preferred_element_type=jnp.float32)
                      + b_ref[...])
    return _edge_kernel


def edge_gauss_linear_stacked(dpos, offsets, coeff, w_stacked, b_stacked, *, te=1024):
    """GaussianSmearing(||dpos||) @ [W_0|...|W_{B-1}] + [b_0|...|b_{B-1}]  ->  [E, B*ng]."""
    e = int(dpos.shape[0])
    ng = int(offsets.shape[0])
    n_out = int(w_stacked.shape[1])
    if e == 0:
        return jnp.zeros((0, n_out), jnp.float32)
    n_out_pad = _round_up(n_out, 128)                 # lane-dense output stores
    if n_out_pad != n_out:
        w_stacked = jnp.pad(w_stacked, ((0, 0), (0, n_out_pad - n_out)))
        b_stacked = jnp.pad(b_stacked, (0, n_out_pad - n_out))
    tile, e_run = _row_tile(e, te)
    dpos = dpos.astype(jnp.float32)
    if e_run != e:                                     # only when e < 8
        dpos = jnp.pad(dpos, ((0, e_run - e), (0, 0)))
    out = pl.pallas_call(
        _make_edge_kernel(coeff),
        out_shape=jax.ShapeDtypeStruct((e_run, n_out_pad), jnp.float32),
        grid_spec=pltpu.PrefetchScalarGridSpec(
            num_scalar_prefetch=0,
            grid=(pl.cdiv(e_run, tile),),
            in_specs=[
                pl.BlockSpec((tile, 3), lambda i: (i, 0)),            # dpos, 3 lanes only
                pl.BlockSpec((1, ng), lambda i: (0, 0)),              # offsets
                pl.BlockSpec((ng, n_out_pad), lambda i: (0, 0)),      # stacked weights
                pl.BlockSpec((1, n_out_pad), lambda i: (0, 0)),       # stacked bias
            ],
            out_specs=pl.BlockSpec((tile, n_out_pad), lambda i: (i, 0)),
        ),
        compiler_params=pltpu.CompilerParams(dimension_semantics=("parallel",)),
    )(dpos,
      offsets.reshape(1, ng).astype(jnp.float32),
      w_stacked.astype(jnp.float32),
      b_stacked.reshape(1, n_out_pad).astype(jnp.float32))
    return out[:e, :n_out]


# ----------------------------------------------------------------------------
# Host-side graph construction glue (data dependent -> no clean Pallas mapping)
# ----------------------------------------------------------------------------
def radius_graph_np(pos, batch, r, max_num_neighbors):
    # TODO(synk): torch_geometric caps neighbors in an implementation-defined
    # order; here we keep the nearest ones.
    pos = np.asarray(pos); batch = np.asarray(batch)
    n = pos.shape[0]
    if n == 0:
        return np.zeros((0,), np.int32), np.zeros((0,), np.int32)
    d = np.sqrt(((pos[:, None, :] - pos[None, :, :]) ** 2).sum(-1))
    ok = (d <= r) & (batch[:, None] == batch[None, :]) & ~np.eye(n, dtype=bool)
    rows, cols = [], []
    for i in range(n):
        cand = np.nonzero(ok[i])[0]
        cand = cand[np.argsort(d[i, cand])][:max_num_neighbors]
        rows.extend([i] * cand.shape[0]); cols.extend(cand.tolist())
    return np.asarray(rows, np.int32), np.asarray(cols, np.int32)


def radius_np(x, y, r, batch_x, batch_y, max_num_neighbors):
    # PyG radius(x, y, ...): for each point in y find points in x within r.
    x = np.asarray(x); y = np.asarray(y)
    batch_x = np.asarray(batch_x); batch_y = np.asarray(batch_y)
    if x.shape[0] == 0 or y.shape[0] == 0:
        return np.zeros((0,), np.int32), np.zeros((0,), np.int32)
    d = np.sqrt(((x[None, :, :] - y[:, None, :]) ** 2).sum(-1))    # [Ny, Nx]
    ok = (d <= r) & (batch_x[None, :] == batch_y[:, None])
    rows, cols = [], []
    for i in range(y.shape[0]):
        cand = np.nonzero(ok[i])[0]
        cand = cand[np.argsort(d[i, cand])][:max_num_neighbors]
        rows.extend([i] * cand.shape[0]); cols.extend(cand.tolist())
    return np.asarray(rows, np.int32), np.asarray(cols, np.int32)


# ----------------------------------------------------------------------------
# Parameters (deterministic, synthetic)
# ----------------------------------------------------------------------------
def gaussian_smearing_consts(stop, num_gaussians, start=0.0):
    offsets = np.linspace(start, stop, num_gaussians, dtype=np.float32)
    coeff = -0.5 / float(offsets[1] - offsets[0]) ** 2
    return jnp.asarray(offsets), coeff


def init_params(key, c_s, c_s_inputs, c_z, c_noise, n_blocks):
    keys = iter(jax.random.split(key, 8 + 8 * n_blocks))

    def lin(kin, kout, bias=True, scale=0.02):
        w = jax.random.normal(next(keys), (kin, kout), jnp.float32) * scale
        b = (jax.random.normal(next(keys), (kout,), jnp.float32) * scale
             if bias else jnp.zeros((kout,), jnp.float32))
        return dict(w=w, b=b)

    d_prot = c_s + c_s_inputs
    d_lig = c_s + c_s_inputs + 2048
    ng = c_z // 4
    p = {
        "protein_token_norm": dict(g=jnp.ones((d_prot,)), b=jnp.zeros((d_prot,))),
        "protein_token_emb": lin(d_prot, c_z),
        "ligand_token_norm": dict(g=jnp.ones((d_lig,)), b=jnp.zeros((d_lig,))),
        "ligand_token_emb": lin(d_lig, c_z),
        "layernorm_n": dict(g=jnp.ones((c_noise,)), b=jnp.zeros((c_noise,))),
        "linear_no_bias_n": lin(c_noise, c_z, bias=False),
        "blocks": [dict(protein_edge_emb=lin(ng, ng), ligand_edge_emb=lin(ng, ng))
                   for _ in range(n_blocks)],
    }
    return p


# ----------------------------------------------------------------------------
# Token_Encoder forward
# ----------------------------------------------------------------------------
def token_encoder_forward(params, r_noisy, token_emb, smile_emb, atom_to_token_idx,
                          noise_n, is_protein, is_ligand, token_batch,
                          protein_atom_to_token_idx, *, c_z, n_blocks):
    b, n, _ = r_noisy.shape
    is_protein = is_protein.astype(bool)
    is_ligand = is_ligand.astype(bool)
    r_flat = r_noisy.reshape(b * n, 3)

    num_tokens = int(jnp.max(atom_to_token_idx)) + 1
    is_token = jax.ops.segment_max(is_protein.astype(jnp.int32), atom_to_token_idx,
                                   num_segments=num_tokens)
    protein_token_mask = is_token == 1

    protein_token = token_emb[protein_token_mask]
    protein_pos = r_flat[is_protein]
    n_prot_tok = int(jnp.max(protein_atom_to_token_idx)) + 1
    psum = jax.ops.segment_sum(protein_pos, protein_atom_to_token_idx, num_segments=n_prot_tok)
    pcnt = jax.ops.segment_sum(jnp.ones((protein_pos.shape[0],), jnp.float32),
                               protein_atom_to_token_idx, num_segments=n_prot_tok)
    protein_token_pos = psum / jnp.maximum(pcnt, 1.0)[:, None]          # scatter_mean
    protein_batch = token_batch[protein_token_mask]

    ligand_token_mask = jnp.logical_not(protein_token_mask)
    ligand_token = token_emb[ligand_token_mask]
    ligand_pos = r_flat[is_ligand]
    ligand_batch = token_batch[ligand_token_mask]

    protein_edge_index = radius_graph_np(protein_token_pos, protein_batch, r=15,
                                         max_num_neighbors=30)
    ligand_edge_index = radius_graph_np(ligand_pos, ligand_batch, r=6,
                                        max_num_neighbors=10)
    # Cross-graph edges are built per the reference but their consumers
    # (L2P_Inter_Layer / P2L_Inter_Layer) are undefined in the source.
    _l2p_edge_index = radius_np(ligand_pos, protein_token_pos, 12,
                                ligand_batch, protein_batch, max_num_neighbors=10)
    _p2l_edge_index = radius_np(protein_token_pos, ligand_pos, 12,
                                protein_batch, ligand_batch, max_num_neighbors=30)

    smile_rep = jnp.broadcast_to(smile_emb, (ligand_token.shape[0], smile_emb.shape[-1]))
    ligand_token = jnp.concatenate([ligand_token, smile_rep], axis=-1)

    # noise_emb = LinearNoBias(LayerNorm(noise_n)) -- one row per batch element:
    # plain JAX (a pallas_call here is pure launch overhead); fused into the
    # token kernels below as a pre-gathered residual.
    nl = _layernorm_jax(noise_n.astype(jnp.float32),
                        params["layernorm_n"]["g"], params["layernorm_n"]["b"])
    noise_emb = nl @ params["linear_no_bias_n"]["w"]

    # token embeddings: fused LayerNorm + Linear + bias + noise residual (Pallas)
    protein_token = ln_linear_residual(
        protein_token,
        params["protein_token_norm"]["g"], params["protein_token_norm"]["b"],
        params["protein_token_emb"]["w"], params["protein_token_emb"]["b"],
        noise_emb[protein_batch])
    ligand_token = ln_linear_residual(
        ligand_token,
        params["ligand_token_norm"]["g"], params["ligand_token_norm"]["b"],
        params["ligand_token_emb"]["w"], params["ligand_token_emb"]["b"],
        noise_emb[ligand_batch])

    ng = c_z // 4
    prot_offsets, prot_coeff = gaussian_smearing_consts(stop=15, num_gaussians=ng)
    lig_offsets, lig_coeff = gaussian_smearing_consts(stop=5, num_gaussians=ng)

    # Edge features for ALL blocks at once: the distance + GaussianSmearing is
    # identical across blocks, so it is hoisted out of the block loop and the
    # per-block edge_emb weights are stacked into a single matmul per edge type.
    edge_attrs = {"protein": [], "ligand": []}

    prow, pcol = protein_edge_index
    if prow.shape[0] > 0:
        w_stack = jnp.concatenate([params["blocks"][i]["protein_edge_emb"]["w"]
                                   for i in range(n_blocks)], axis=1)
        b_stack = jnp.concatenate([params["blocks"][i]["protein_edge_emb"]["b"]
                                   for i in range(n_blocks)], axis=0)
        # NOTE: protein_edge_index was built on protein_token_pos (token centroids),
        # so those are the positions its indices refer to.  The PyTorch source
        # passes per-atom protein_pos into Protein_Token_Layer, which only avoids
        # an index error because n_atoms >= n_tokens.
        dpos = protein_token_pos[prow] - protein_token_pos[pcol]
        attr_all = edge_gauss_linear_stacked(dpos, prot_offsets, prot_coeff,
                                             w_stack, b_stack)
        edge_attrs["protein"] = [attr_all[:, i * ng:(i + 1) * ng] for i in range(n_blocks)]

    lrow, lcol = ligand_edge_index
    if lrow.shape[0] > 0:
        w_stack = jnp.concatenate([params["blocks"][i]["ligand_edge_emb"]["w"]
                                   for i in range(n_blocks)], axis=1)
        b_stack = jnp.concatenate([params["blocks"][i]["ligand_edge_emb"]["b"]
                                   for i in range(n_blocks)], axis=0)
        dpos = ligand_pos[lrow] - ligand_pos[lcol]
        attr_all = edge_gauss_linear_stacked(dpos, lig_offsets, lig_coeff,
                                             w_stack, b_stack)
        edge_attrs["ligand"] = [attr_all[:, i * ng:(i + 1) * ng] for i in range(n_blocks)]

    # TODO(synk): Attention_Layer / L2P_Inter_Layer / P2L_Inter_Layer are not
    # defined in the reference source, so the per-block residual token updates
    # that consume edge_attrs are omitted; tokens pass through unchanged.

    return protein_token, ligand_token, edge_attrs


# ----------------------------------------------------------------------------
if __name__ == "__main__":
    key = jax.random.PRNGKey(0)
    k_pos, k_tok, k_smile, k_noise, k_par = jax.random.split(key, 5)

    # small, Pallas-friendly config (c_s + c_s_inputs = 128, c_z = 128)
    c_s, c_s_inputs, c_z, c_noise, n_blocks = 64, 64, 128, 256, 2

    b = 1
    n_prot_atoms, n_lig_atoms = 24, 8          # 3 atoms / protein token; ligand atom == token
    n_atoms = n_prot_atoms + n_lig_atoms
    n_prot_tokens = 8
    num_tokens = n_prot_tokens + n_lig_atoms   # 16

    r_noisy = jax.random.normal(k_pos, (b, n_atoms, 3), jnp.float32) * 1.5
    token_emb = jax.random.normal(k_tok, (num_tokens, c_s + c_s_inputs), jnp.float32)
    smile_emb = jax.random.normal(k_smile, (1, 2048), jnp.float32)
    noise_n = jax.random.normal(k_noise, (b, c_noise), jnp.float32)

    atom_to_token_idx = jnp.concatenate([
        jnp.repeat(jnp.arange(n_prot_tokens, dtype=jnp.int32), 3),
        jnp.arange(n_prot_tokens, num_tokens, dtype=jnp.int32)])
    protein_atom_to_token_idx = jnp.repeat(jnp.arange(n_prot_tokens, dtype=jnp.int32), 3)
    is_protein = jnp.concatenate([jnp.ones((n_prot_atoms,), bool), jnp.zeros((n_lig_atoms,), bool)])
    is_ligand = jnp.logical_not(is_protein)
    token_batch = jnp.zeros((num_tokens,), jnp.int32)

    params = init_params(k_par, c_s, c_s_inputs, c_z, c_noise, n_blocks)

    protein_out, ligand_out, edge_attrs = token_encoder_forward(
        params, r_noisy, token_emb, smile_emb, atom_to_token_idx, noise_n,
        is_protein, is_ligand, token_batch, protein_atom_to_token_idx,
        c_z=c_z, n_blocks=n_blocks)

    jax.block_until_ready((protein_out, ligand_out, edge_attrs))
    assert protein_out.shape == (n_prot_tokens, c_z)
    assert ligand_out.shape == (n_lig_atoms, c_z)
    ng = c_z // 4
    for ea in edge_attrs["protein"]:
        assert ea.shape[1] == ng and bool(jnp.all(jnp.isfinite(ea)))
    for ea in edge_attrs["ligand"]:
        assert ea.shape[1] == ng and bool(jnp.all(jnp.isfinite(ea)))
    assert bool(jnp.all(jnp.isfinite(protein_out))) and bool(jnp.all(jnp.isfinite(ligand_out)))
    print("KERNEL_OK")
</pallas_src>

<mosaic_0001>
module attributes {stable_mosaic.version = 11 : i64} {
  func.func @_ln_linear_res_kernel(%arg0: i32, %arg1: memref<8x128xf32, #tpu.memory_space<vmem>>, %arg2: memref<1x128xf32, #tpu.memory_space<vmem>>, %arg3: memref<1x128xf32, #tpu.memory_space<vmem>>, %arg4: memref<128x128xf32, #tpu.memory_space<vmem>>, %arg5: memref<1x128xf32, #tpu.memory_space<vmem>>, %arg6: memref<8x128xf32, #tpu.memory_space<vmem>>, %arg7: memref<8x128xf32, #tpu.memory_space<vmem>>) attributes {dimension_semantics = [#tpu.dimension_semantics<parallel>], iteration_bounds = array<i64: 1>, scalar_prefetch = 0 : i64, scratch_operands = 0 : i64, tpu.core_type = #tpu.core_type<tc>, window_params = [{transform_indices = @transform_0, window_bounds = array<i64: 8, 128>}, {pipeline_mode = #tpu.pipeline_mode<synchronous>, transform_indices = @transform_1, window_bounds = array<i64: 1, 128>}, {pipeline_mode = #tpu.pipeline_mode<synchronous>, transform_indices = @transform_2, window_bounds = array<i64: 1, 128>}, {pipeline_mode = #tpu.pipeline_mode<synchronous>, transform_indices = @transform_3, window_bounds = array<i64: 128, 128>}, {pipeline_mode = #tpu.pipeline_mode<synchronous>, transform_indices = @transform_4, window_bounds = array<i64: 1, 128>}, {transform_indices = @transform_5, window_bounds = array<i64: 8, 128>}, {transform_indices = @transform_6, window_bounds = array<i64: 8, 128>}]} {
    %c0 = arith.constant 0 : index
    %c0_0 = arith.constant 0 : index
    %0 = vector.load %arg1[%c0, %c0_0] : memref<8x128xf32, #tpu.memory_space<vmem>>, vector<8x128xf32>
    %cst = arith.constant dense<0.000000e+00> : vector<8xf32>
    %1 = vector.multi_reduction <add>, %0, %cst [1] : vector<8x128xf32> to vector<8xf32>
    %2 = vector.shape_cast %1 : vector<8xf32> to vector<8x1xf32>
    %cst_1 = arith.constant 1.280000e+02 : f32
    %3 = vector.broadcast %cst_1 : f32 to vector<8x1xf32>
    %4 = arith.divf %2, %3 : vector<8x1xf32>
    %5 = vector.broadcast %4 : vector<8x1xf32> to vector<8x128xf32>
    %6 = arith.subf %0, %5 : vector<8x128xf32>
    %7 = arith.mulf %6, %6 : vector<8x128xf32>
    %cst_2 = arith.constant dense<0.000000e+00> : vector<8xf32>
    %8 = vector.multi_reduction <add>, %7, %cst_2 [1] : vector<8x128xf32> to vector<8xf32>
    %9 = vector.shape_cast %8 : vector<8xf32> to vector<8x1xf32>
    %cst_3 = arith.constant 1.280000e+02 : f32
    %10 = vector.broadcast %cst_3 : f32 to vector<8x1xf32>
    %11 = arith.divf %9, %10 : vector<8x1xf32>
    %cst_4 = arith.constant 9.99999974E-6 : f32
    %12 = vector.broadcast %cst_4 : f32 to vector<8x1xf32>
    %13 = arith.addf %11, %12 : vector<8x1xf32>
    %14 = math.rsqrt %13 : vector<8x1xf32>
    %15 = vector.broadcast %14 : vector<8x1xf32> to vector<8x128xf32>
    %16 = arith.mulf %6, %15 : vector<8x128xf32>
    %c0_5 = arith.constant 0 : index
    %c0_6 = arith.constant 0 : index
    %17 = vector.load %arg2[%c0_5, %c0_6] : memref<1x128xf32, #tpu.memory_space<vmem>>, vector<1x128xf32>
    %18 = vector.broadcast %17 : vector<1x128xf32> to vector<8x128xf32>
    %19 = arith.mulf %16, %18 : vector<8x128xf32>
    %c0_7 = arith.constant 0 : index
    %c0_8 = arith.constant 0 : index
    %20 = vector.load %arg3[%c0_7, %c0_8] : memref<1x128xf32, #tpu.memory_space<vmem>>, vector<1x128xf32>
    %21 = vector.broadcast %20 : vector<1x128xf32> to vector<8x128xf32>
    %22 = arith.addf %19, %21 : vector<8x128xf32>
    %c0_9 = arith.constant 0 : index
    %c0_10 = arith.constant 0 : index
    %23 = vector.load %arg4[%c0_9, %c0_10] : memref<128x128xf32, #tpu.memory_space<vmem>>, vector<128x128xf32>
    %cst_11 = arith.constant dense<0.000000e+00> : vector<8x128xf32>
    %24 = tpu.matmul %22, %23, %cst_11 {dimension_numbers = #tpu.dot_dimension_numbers<[1], [0], [0], [1], [0, 0, 1, 1], [], []>} : vector<8x128xf32>, vector<128x128xf32>, vector<8x128xf32> -> vector<8x128xf32>
    %c0_12 = arith.constant 0 : index
    %c0_13 = arith.constant 0 : index
    %25 = vector.load %arg5[%c0_12, %c0_13] : memref<1x128xf32, #tpu.memory_space<vmem>>, vector<1x128xf32>
    %26 = vector.broadcast %25 : vector<1x128xf32> to vector<8x128xf32>
    %27 = arith.addf %24, %26 : vector<8x128xf32>
    %c0_14 = arith.constant 0 : index
    %c0_15 = arith.constant 0 : index
    %28 = vector.load %arg6[%c0_14, %c0_15] : memref<8x128xf32, #tpu.memory_space<vmem>>, vector<8x128xf32>
    %29 = arith.addf %27, %28 : vector<8x128xf32>
    %c0_16 = arith.constant 0 : index
    %c0_17 = arith.constant 0 : index
    %30 = vector.load %arg7[%c0_16, %c0_17] : memref<8x128xf32, #tpu.memory_space<vmem>>, vector<8x128xf32>
    tpu.vector_store %arg7[%c0_16, %c0_17], %29 {strides = array<i32>} : memref<8x128xf32, #tpu.memory_space<vmem>>, vector<8x128xf32>,
    return
  }
  func.func @transform_0(%arg0: i32) -> (i32, i32) {
    %c0_i32 = arith.constant 0 : i32
    %c0_i32_0 = arith.constant 0 : i32
    return %arg0, %c0_i32 : i32, i32
  }
  func.func @transform_1(%arg0: i32) -> (i32, i32) {
    %c0_i32 = arith.constant 0 : i32
    %c0_i32_0 = arith.constant 0 : i32
    %c0_i32_1 = arith.constant 0 : i32
    return %c0_i32, %c0_i32_0 : i32, i32
  }
  func.func @transform_2(%arg0: i32) -> (i32, i32) {
    %c0_i32 = arith.constant 0 : i32
    %c0_i32_0 = arith.constant 0 : i32
    %c0_i32_1 = arith.constant 0 : i32
    return %c0_i32, %c0_i32_0 : i32, i32
  }
  func.func @transform_3(%arg0: i32) -> (i32, i32) {
    %c0_i32 = arith.constant 0 : i32
    %c0_i32_0 = arith.constant 0 : i32
    %c0_i32_1 = arith.constant 0 : i32
    return %c0_i32, %c0_i32_0 : i32, i32
  }
  func.func @transform_4(%arg0: i32) -> (i32, i32) {
    %c0_i32 = arith.constant 0 : i32
    %c0_i32_0 = arith.constant 0 : i32
    %c0_i32_1 = arith.constant 0 : i32
    return %c0_i32, %c0_i32_0 : i32, i32
  }
  func.func @transform_5(%arg0: i32) -> (i32, i32) {
    %c0_i32 = arith.constant 0 : i32
    %c0_i32_0 = arith.constant 0 : i32
    return %arg0, %c0_i32 : i32, i32
  }
  func.func @transform_6(%arg0: i32) -> (i32, i32) {
    %c0_i32 = arith.constant 0 : i32
    %c0_i32_0 = arith.constant 0 : i32
    return %arg0, %c0_i32 : i32, i32
  }
}

</mosaic_0001>

<bundles_post_ra>
// kernel: tpu_custom_call.1
= control target key start
LH: loop header
LB: loop body
LE: loop exit
PB: predicated region body
PF: predicated region fallthrough
CT: control target
= control target key end

     0   :  { %11 = vsyncpa [#allocation3], 0  ;;  %s388_s0 = inlined_call_operand.hbm [shape: f32[8,128], index: 0, kind: input, shape index: {}]   ;;  %s389_s1 = inlined_call_operand.hbm [shape: f32[1,128], index: 1, kind: input, shape index: {}]   ;;  %s390_s2 = inlined_call_operand.vmem [shape: f32[1,128], index: 2, kind: input, shape index: {}]   ;;  %s391_s3 = inlined_call_operand.hbm [shape: f32[128,128], index: 3, kind: input, shape index: {}]   ;;  %s392_s4 = inlined_call_operand.vmem [shape: f32[1,128], index: 4, kind: input, shape index: {}]   ;;  %s393_s5 = inlined_call_operand.hbm [shape: f32[8,128], index: 5, kind: input, shape index: {}]   ;;  %s394_s6 = inlined_call_operand.hbm [shape: f32[8,128], index: 6, kind: output, shape index: {}]  }
   0x1   :  { %12 = vsyncpa [#allocation6], 0 }
   0x2   :  { %13 = vsyncpa [#allocation9], 0  ;;  %s31_s23 = sshll.u32 %s389_s1, 4  ;;  %s32_s23 = int_to_ptr.hbm [resolvable:$true] %s31_s23 }
   0x3   :  { %14 = vsyncpa [#allocation4], 0  ;;  %s324_s24 = smov [#allocation5]   ;;  %s20_s28 = sshll.u32 %s388_s0, 4  ;;  %s21_s28 = int_to_ptr.hbm [resolvable:$true] %s20_s28 }
   0x4   :  { %s33_s25 = sshll.u32 %s324_s24, 4  ;;  %s325_s29 = smov [#allocation2]   ;;  %s34_s25 = int_to_ptr.vmem [resolvable:$true] %s33_s25 }
   0x5   :  { %36 = dma.hbm_to_vmem [thread:$0]  %s32_s23, 16, %s34_s25, [#allocation6]  }
   0x6   :  { %s22_s30 = sshll.u32 %s325_s29, 4  ;;  %s43_s9 = sshll.u32 %s391_s3, 4  ;;  %s23_s30 = int_to_ptr.vmem [resolvable:$true] %s22_s30  ;;  %s44_s9 = int_to_ptr.hbm [resolvable:$true] %s43_s9 }
   0x7   :  { %25 = dma.hbm_to_vmem [thread:$0]  %s21_s28, 128, %s23_s30, [#allocation3]  }
   0x8   :  { %s326_s1 = smov [#allocation7]   ;;  %s59_s13 = sshll.u32 %s393_s5, 4  ;;  %s60_s13 = int_to_ptr.hbm [resolvable:$true] %s59_s13 }
   0x9   :  { %s45_s10 = sshll.u32 %s326_s1, 4  ;;  %s327_s14 = smov 128   ;;  %s46_s10 = int_to_ptr.vmem [resolvable:$true] %s45_s10 }
   0xa   :  { %s328_s0 = smov 8   ;;  %s329_s15 = smov [#allocation8]  }
   0xb   :  { %51 = dma.hbm_to_vmem [thread:$0]  %s44_s9, 2048, %s46_s10, [#allocation6], %s327_s14, %s327_s14, %s328_s0  }
   0xc   :  { %s61_s16 = sshll.u32 %s329_s15, 4  ;;  %s62_s16 = int_to_ptr.vmem [resolvable:$true] %s61_s16 }
   0xd   :  { %64 = dma.hbm_to_vmem [thread:$0]  %s60_s13, 128, %s62_s16, [#allocation9]  }
   0xe   :  { %316 = dma.done.wait [#allocation3], 128  }
   0xf   :  { %317 = vsyncadd [#allocation3], 4294967168 }
  0x10   :  { %318 = dma.done.wait [#allocation6], 2064  }
  0x11   :  { %319 = vsyncadd [#allocation6], 4294965232 }
  0x12   :  { %320 = dma.done.wait [#allocation9], 128  }
  0x13   :  { %321 = vsyncadd [#allocation9], 4294967168  ;;  %v81_v0 = vld [vmem:[#allocation2] sm:$0xff]  ;;  %v330_v1 = vmov 128.0   ;;  %v132_v14 = vld [vmem:[#allocation7 + $0x68] sm:$0xff]  ;;  %s331_s19 = smov [#allocation10]  }
  0x14   :  { %82 = vadd.xlane.f32.xlu0 %v81_v0  ;;  %192 = vrcp.f32 %v330_v1  ;;  %v134_v2 = vld [vmem:[#allocation7 + $0x78] sm:$0xff]  ;;  %v133_v3 = vld [vmem:[#allocation7 + $0x70] sm:$0xff]  ;;  %v131_v15 = vld [vmem:[#allocation7 + $0x60] sm:$0xff]  ;;  %s167_s20 = sshll.u32 %s331_s19, 4  ;;  %s169_s23 = sshll.u32 %s394_s6, 4  ;;  %s168_s20 = int_to_ptr.vmem [resolvable:$true] %s167_s20  ;;  %s170_s23 = int_to_ptr.hbm [resolvable:$true] %s169_s23 }
  0x15   :  { %139 = vmatpush.msra.mxu0 %v134_v2  ;;  %v130_v16 = vld [vmem:[#allocation7 + $0x58] sm:$0xff]  ;;  %v129_v17 = vld [vmem:[#allocation7 + $0x50] sm:$0xff]  ;;  %v128_v18 = vld [vmem:[#allocation7 + $0x48] sm:$0xff] }
  0x16   :  { %v127_v19 = vld [vmem:[#allocation7 + $0x40] sm:$0xff]  ;;  %v126_v20 = vld [vmem:[#allocation7 + $0x38] sm:$0xff]  ;;  %v125_v21 = vld [vmem:[#allocation7 + $0x30] sm:$0xff] }
  0x17   :  { %140 = vmatpush.msra.mxu0 %v133_v3  ;;  %v124_v22 = vld [vmem:[#allocation7 + $0x28] sm:$0xff]  ;;  %v123_v23 = vld [vmem:[#allocation7 + $0x20] sm:$0xff]  ;;  %v122_v24 = vld [vmem:[#allocation7 + $0x18] sm:$0xff] }
  0x18   :  { %v121_v25 = vld [vmem:[#allocation7 + $0x10] sm:$0xff]  ;;  %v120_v26 = vld [vmem:[#allocation7 + $0x8] sm:$0xff]  ;;  %v119_v27 = vld [vmem:[#allocation7] sm:$0xff] }
  0x19   :  { %141 = vmatpush.msra.mxu0 %v132_v14  ;;  %v189_v37 = vld [vmem:[#allocation5] ss:$0 sm:$0xff]  ;;  %v190_v40 = vld [vmem:[%s390_s2] ss:$0 sm:$0xff]  ;;  %v159_v45 = vld [vmem:[#allocation8] sm:$0xff] }
  0x1a   :  { %v193_v4 = vpop.eup %192  ;;  %v191_v43 = vld [vmem:[%s392_s4] ss:$0 sm:$0xff] }
  0x1b   :  { %v85_v5 = vmul.f32 128.0, %v193_v4  ;;  %vm89_vm0 = vweird.f32 %v193_v4  ;;  %142 = vmatpush.msra.mxu0 %v131_v15 }
  0x1d   :  { %v86_v6 = vsub.f32 1.0, %v85_v5  ;;  %143 = vmatpush.msra.mxu0 %v130_v16 }
  0x1f   :  { %v87_v7 = vmul.f32 %v193_v4, %v86_v6  ;;  %144 = vmatpush.msra.mxu0 %v129_v17 }
  0x21   :  { %v88_v8 = vadd.f32 %v193_v4, %v87_v7  ;;  %145 = vmatpush.msra.mxu0 %v128_v18 }
  0x23   :  { %v90_v9 = vsel %vm89_vm0, %v193_v4, %v88_v8  ;;  %146 = vmatpush.msra.mxu0 %v127_v19 }
  0x25   :  { %147 = vmatpush.msra.mxu0 %v126_v20 }
  0x27   :  { %148 = vmatpush.msra.mxu0 %v125_v21 }
  0x29   :  { %149 = vmatpush.msra.mxu0 %v124_v22 }
  0x2b   :  { %150 = vmatpush.msra.mxu0 %v123_v23 }
  0x2d   :  { %151 = vmatpush.msra.mxu0 %v122_v24 }
  0x2f   :  { %152 = vmatpush.msra.mxu0 %v121_v25 }
  0x31   :  { %153 = vmatpush.msra.mxu0 %v120_v26 }
  0x33   :  { %154 = vmatpush.msra.mxu0 %v119_v27 }
  0x87   :  { %v83_v10 = vpop.xlane.xlu0 %82 }
  0x88   :  { %v91_v11 = vmul.f32 %v90_v9, %v83_v10 }
  0x8a   :  { %v92_v12 = vsub.f32 %v81_v0, %v91_v11 }
  0x8c   :  { %v93_v13 = vmul.f32 %v92_v12, %v92_v12 }
  0x8e   :  { %94 = vadd.xlane.f32.xlu0 %v93_v13 }
 0x101   :  { %v95_v28 = vpop.xlane.xlu0 %94 }
 0x102   :  { %v96_v29 = vmul.f32 %v95_v28, %v90_v9 }
 0x104   :  { %v97_v30 = vadd.f32 1e-05, %v96_v29 }
 0x106   :  { %194 = vrsqrt.f32 %v97_v30  ;;  %vm104_vm2 = vweird.f32 %v97_v30 }
 0x10c   :  { %v195_v31 = vpop.eup %194 }
 0x10d   :  { %v99_v32 = vmul.f32 %v195_v31, %v97_v30  ;;  %vm105_vm1 = vweird.f32 %v195_v31 }
 0x10e   :  { %vm106_vm3 = vmor %vm104_vm2, %vm105_vm1 }
 0x10f   :  { %v100_v33 = vmul.f32 %v195_v31, %v99_v32 }
 0x111   :  { %v101_v34 = vmul.f32 0.5, %v100_v33 }
 0x113   :  { %v102_v35 = vsub.f32 1.5, %v101_v34 }
 0x115   :  { %v103_v36 = vmul.f32 %v195_v31, %v102_v35 }
 0x117   :  { %v107_v38 = vsel %vm106_vm3, %v195_v31, %v103_v36 }
 0x118   :  { %v108_v39 = vmul.f32 %v107_v38, %v92_v12 }
 0x11a   :  { %v113_v41 = vmul.f32 %v189_v37, %v108_v39 }
 0x11c   :  { %v118_v42 = vadd.f32 %v190_v40, %v113_v41 }
 0x11e   :  { %155 = vmatmul.f32.vlgmr.msra.gmra.mxu0 %v118_v42 }
 0x19b   :  { %v156_v44 = vpop.f32.mrf.mxu0 }
 0x19c   :  { %v157_v46 = vadd.f32 %v191_v43, %v156_v44 }
 0x19e   :  { %v160_v47 = vadd.f32 %v159_v45, %v157_v46 }
 0x1a0   :  { %161 = vst [vmem:[#allocation10] sm:$0xff] %v160_v47 }
 0x1a1   :  { %172 = dma.vmem_to_hbm [thread:$0]  %s168_s20, 128, %s170_s23, [#allocation4]  }
 0x1a2   :  { %322 = dma.done.wait [#allocation4], 128  }
 0x1a3   :  { %323 = vsyncadd [#allocation4], 4294967168 }
 0x1a4   :  { %177 = vsyncpa [#allocation3], 1 }
 0x1a5   :  { %178 = vsyncpa [#allocation6], 1 }
 0x1a6   :  { %179 = vsyncpa [#allocation9], 1 }
 0x1a7   :  { %180 = vsyncpa [#allocation4], 1 }

</bundles_post_ra>
